<compile_context>
chip_gen: v6e
topology: v6e:2x2x1
jax: 0.10.0
libtpu: 0.0.40
codegen_flags: <defaults>
</compile_context>

<pallas_src>
import functools
import math

import jax
import jax.numpy as jnp
from jax import lax
from jax.experimental import pallas as pl
from jax.experimental.pallas import tpu as pltpu


def _round_up(x, m):
    return ((x + m - 1) // m) * m


def _plan_rows(rows, width, itemsize, block_bytes):
    """Pick the row-tile TH (sublane axis) and the (outer, inner) grid split."""
    w_pad = _round_up(width, 128)                       # lanes one block occupies in VMEM
    budget = max(8, (block_bytes // (w_pad * itemsize)) // 8 * 8)
    th = min(budget, _round_up(rows, 8))
    if rows % th != 0:
        # Prefer a multiple-of-8 tile (>= half the budget) that covers `rows` exactly with an
        # even tile count: exact cover lets the kernel skip the ragged-row mask entirely.
        d = th
        while d >= max(8, th // 2):
            if rows % d == 0 and (rows // d < 2 or (rows // d) % 2 == 0):
                th = d
                break
            d -= 8
    if th > rows:                                       # single full-extent tile, never ragged
        th = rows
    n_tiles = -(-rows // th)
    n_outer = 2 if n_tiles >= 2 else 1                  # always 2-way for v7x's two TensorCores
    n_inner = -(-n_tiles // n_outer)
    return th, n_tiles, n_outer, n_inner


def _pll_kernel(x_ref, t_ref, o_ref, mx_ref, mn_ref, sm_ref, *,
                n_inner, tile_rows, rows, width, smooth, needs_mask):
    """One (TILE_ROWS, WIDTH) tile of one batch element's row x lane slab.

    x_ref: logits tile; t_ref: supervision tile (-1 ignore, 0 bg, 1 fg), any dtype.
    o_ref: (1, 3) per-(batch, partition) partials [raw max, raw min, point loss sum].
    mx/mn/sm_ref: tile-shaped running accumulators (elementwise only in the hot loop).
    """
    i = pl.program_id(2)

    @pl.when(i == 0)
    def _init():
        mx_ref[...] = jnp.full_like(mx_ref, -jnp.inf)
        mn_ref[...] = jnp.full_like(mn_ref, jnp.inf)
        sm_ref[...] = jnp.zeros_like(sm_ref)

    x = x_ref[...]
    if x.dtype != jnp.float32:
        x = x.astype(jnp.float32)        # bf16 logit streams are upcast per tile
    # Single convert keeps the {-1,0,1} labels (and every derived mask) in the f32 layout,
    # avoiding packed sub-byte mask relayouts; targets still stream at their input width.
    t = t_ref[...].astype(jnp.float32)

    if needs_mask:
        # Ragged last tile / duplicated tail tile of the 2-way outer split: rows at or past
        # `rows` hold unspecified VMEM data and must not reach the accumulators.
        g = pl.program_id(1) * n_inner + i               # unclamped global tile index
        rid = lax.broadcasted_iota(jnp.int32, (tile_rows, width), 0) + g * tile_rows
        valid = rid < rows
        x_mx = jnp.where(valid, x, -jnp.inf)
        x_mn = jnp.where(valid, x, jnp.inf)
        t = jnp.where(valid, t, -1.0)
    else:
        x_mx = x
        x_mn = x

    # Image-level stats: sigmoid is monotone, so only raw-logit extrema are tracked here and
    # sigmoid+log runs once per batch element in the wrapper.  Elementwise (VPU) accumulation
    # only -- cross-lane/sublane reductions are deferred to the finalize branch.
    mx_ref[...] = jnp.maximum(mx_ref[...], x_mx)
    mn_ref[...] = jnp.minimum(mn_ref[...], x_mn)

    # Point-level terms, fg and bg merged into one accumulator via a sign select:
    #   fg: -log(sigmoid(x)+smooth)   bg: -log(1-sigmoid(x)+smooth) = -log(sigmoid(-x)+smooth)
    # so both are -log(sigmoid(z)+smooth) with z = +x (fg) / -x (bg).  The +smooth is folded
    # into the exact tanh form of sigmoid; the accumulator carries +log and is negated once at
    # finalize.  (bf16 math here would ~2x VPU throughput on v6e/v7x at a small accuracy cost;
    # kept in f32 so v5e stays legal and the reference semantics are exact.)
    is_fg = t == 1.0
    is_pt = t >= 0.0
    z = jnp.where(is_fg, x, -x)
    v = jnp.log(0.5 * jnp.tanh(0.5 * z) + (0.5 + smooth))    # log(sigmoid(z) + smooth)
    sm_ref[...] += jnp.where(is_pt, v, 0.0)

    @pl.when(i == pl.num_programs(2) - 1)
    def _finalize():
        mx = jnp.max(jnp.max(mx_ref[...], axis=1, keepdims=True), axis=0, keepdims=True)
        mn = jnp.min(jnp.min(mn_ref[...], axis=1, keepdims=True), axis=0, keepdims=True)
        sm = jnp.sum(jnp.sum(sm_ref[...], axis=1, keepdims=True), axis=0, keepdims=True)
        o_ref[:, 0:1] = mx
        o_ref[:, 1:2] = mn
        o_ref[:, 2:3] = -sm


def pll_with_logits(inputs, targets, smooth=1e-10, block_bytes=1536 * 1024):
    """inputs: [B, 1, H, W] logits; targets: [B, 1, H, W] in {-1, 0, 1}. Returns the mean loss."""
    batch = inputs.shape[0]
    width = inputs.shape[-1]
    rows = math.prod(inputs.shape[1:-1])

    # Free (contiguous) re-view: fold rows into the lane axis while W < 128 so vregs are
    # lane-dense; remaining rows land on the sublane axis.  No host-side pad/cast passes.
    fold = 1
    while width * fold < 128 and rows % (fold * 2) == 0:
        fold *= 2
    rows //= fold
    width *= fold
    x = inputs.reshape(batch, rows, width)
    t = targets.reshape(batch, rows, width)   # streamed in its incoming dtype (int8 cheapest)

    th, n_tiles, n_outer, n_inner = _plan_rows(rows, width, x.dtype.itemsize, block_bytes)
    needs_mask = (n_outer * n_inner * th) != rows

    # Clamp the tile index so the duplicated tail tile of an odd split re-reads real data
    # (its contribution is fully masked in-kernel).
    idx = lambda b, o, i: (b, jnp.minimum(o * n_inner + i, n_tiles - 1), 0)

    w_pad = _round_up(width, 128)
    vmem_need = (2 * th * w_pad * (x.dtype.itemsize + t.dtype.itemsize)
                 + 3 * th * w_pad * 4 + (1 << 20))
    vmem_limit = int(min(48 << 20, max(16 << 20, 2 * vmem_need)))

    partials = pl.pallas_call(
        functools.partial(
            _pll_kernel, n_inner=n_inner, tile_rows=th, rows=rows, width=width,
            smooth=float(smooth), needs_mask=needs_mask),
        out_shape=jax.ShapeDtypeStruct((batch, n_outer, 1, 3), jnp.float32),
        grid=(batch, n_outer, n_inner),
        in_specs=[
            pl.BlockSpec((None, th, width), idx),
            pl.BlockSpec((None, th, width), idx),
        ],
        out_specs=pl.BlockSpec((None, None, 1, 3), lambda b, o, i: (b, o, 0, 0)),
        scratch_shapes=[pltpu.VMEM((th, width), jnp.float32)] * 3,
        compiler_params=pltpu.CompilerParams(
            dimension_semantics=("parallel", "parallel", "arbitrary"),
            vmem_limit_bytes=vmem_limit),
    )(x, t)

    # Tiny per-batch combine + image-level terms on [B] scalars (negligible vs the stream).
    raw_max = jnp.max(partials[..., 0], axis=(1, 2))
    raw_min = jnp.min(partials[..., 1], axis=(1, 2))
    point_sum = jnp.sum(partials[..., 2], axis=(1, 2))
    presence = -jnp.log(jax.nn.sigmoid(raw_max) + smooth)   # -log(max(S) + smooth)
    absence = -jnp.log(jax.nn.sigmoid(raw_min) + smooth)    # -log(1 - max(1 - S) + smooth)
    return jnp.mean(presence + absence + point_sum)


def _reference(inputs, targets, smooth=1e-10):
    """Pure-JAX reference matching the PyTorch semantics."""
    s = jax.nn.sigmoid(inputs.astype(jnp.float32))
    b = s.shape[0]
    sf = s.reshape(b, -1)
    tf_ = targets.reshape(b, -1).astype(jnp.float32)
    presence = -jnp.log(jnp.max(sf, axis=1) + smooth)
    absence = -jnp.log(1.0 - jnp.max(1.0 - sf, axis=1) + smooth)
    fg = jnp.sum(jnp.where(tf_ == 1.0, -jnp.log(sf + smooth), 0.0), axis=1)
    bg = jnp.sum(jnp.where(tf_ == 0.0, -jnp.log(1.0 - sf + smooth), 0.0), axis=1)
    return jnp.mean(presence + absence + fg + bg)


if __name__ == "__main__":
    key = jax.random.PRNGKey(0)

    def check(preds, sup, **kw):
        loss = pll_with_logits(preds, sup, **kw)
        jax.block_until_ready(loss)
        ref = _reference(preds, sup)
        assert jnp.allclose(loss, ref, rtol=1e-4, atol=1e-4), (loss, ref, preds.shape, kw)
        return loss

    # 1) Small shape consistent with the module ([B, 1, H, W]); exercises the W<128 lane fold.
    k1, k2, key = jax.random.split(key, 3)
    preds = jax.random.normal(k1, (2, 1, 16, 16), dtype=jnp.float32)
    sup = (jax.random.randint(k2, (2, 1, 16, 16), 0, 3) - 1).astype(jnp.int8)
    check(preds, sup)

    # 2) Non-(8,128)-aligned image; single full-extent tile per batch element, no masking.
    k1, k2, key = jax.random.split(key, 3)
    preds2 = jax.random.normal(k1, (2, 1, 181, 181), dtype=jnp.float32)
    sup2 = (jax.random.randint(k2, (2, 1, 181, 181), 0, 3) - 1).astype(jnp.int8)
    check(preds2, sup2)

    # 3) Same data, small block budget: multi-tile stream, 2-way outer split, ragged-row mask.
    check(preds2, sup2, block_bytes=96 * 1024)

    # 4) Odd tile count (duplicated tail tile on partition 1) + float32 targets (no host cast).
    check(preds2, sup2.astype(jnp.float32), block_bytes=64 * 1024)

    print("KERNEL_OK")
</pallas_src>

<mosaic_0001>
module attributes {stable_mosaic.version = 11 : i64} {
  func.func @_pll_kernel(%arg0: i32, %arg1: i32, %arg2: i32, %arg3: memref<1x2x128xf32, #tpu.memory_space<vmem>>, %arg4: memref<1x2x128xi8, #tpu.memory_space<vmem>>, %arg5: memref<1x1x1x3xf32, #tpu.memory_space<vmem>>, %arg6: memref<2x128xf32, #tpu.memory_space<vmem>>, %arg7: memref<2x128xf32, #tpu.memory_space<vmem>>, %arg8: memref<2x128xf32, #tpu.memory_space<vmem>>) attributes {dimension_semantics = [#tpu.dimension_semantics<parallel>, #tpu.dimension_semantics<parallel>, #tpu.dimension_semantics<arbitrary>], iteration_bounds = array<i64: 2, 1, 1>, scalar_prefetch = 0 : i64, scratch_operands = 3 : i64, tpu.core_type = #tpu.core_type<tc>, window_params = [{transform_indices = @transform_0, window_bounds = array<i64: 1, 2, 128>}, {transform_indices = @transform_1, window_bounds = array<i64: 1, 2, 128>}, {transform_indices = @transform_2, window_bounds = array<i64: 1, 1, 1, 3>}]} {
    %c0_i32 = arith.constant 0 : i32
    %0 = arith.cmpi eq, %arg2, %c0_i32 : i32
    %1 = arith.extui %0 : i1 to i32
    %c0_i32_0 = arith.constant 0 : i32
    %2 = arith.cmpi ne, %1, %c0_i32_0 : i32
    scf.if %2 {
      %cst_26 = arith.constant 0xFF800000 : f32
      %37 = vector.broadcast %cst_26 : f32 to vector<2x128xf32>
      %c0_27 = arith.constant 0 : index
      %c0_28 = arith.constant 0 : index
      %38 = vector.load %arg6[%c0_27, %c0_28] : memref<2x128xf32, #tpu.memory_space<vmem>>, vector<2x128xf32>
      tpu.vector_store %arg6[%c0_27, %c0_28], %37 {strides = array<i32>} : memref<2x128xf32, #tpu.memory_space<vmem>>, vector<2x128xf32>,
      %cst_29 = arith.constant 0x7F800000 : f32
      %39 = vector.broadcast %cst_29 : f32 to vector<2x128xf32>
      %c0_30 = arith.constant 0 : index
      %c0_31 = arith.constant 0 : index
      %40 = vector.load %arg7[%c0_30, %c0_31] : memref<2x128xf32, #tpu.memory_space<vmem>>, vector<2x128xf32>
      tpu.vector_store %arg7[%c0_30, %c0_31], %39 {strides = array<i32>} : memref<2x128xf32, #tpu.memory_space<vmem>>, vector<2x128xf32>,
      %cst_32 = arith.constant 0.000000e+00 : f32
      %41 = vector.broadcast %cst_32 : f32 to vector<2x128xf32>
      %c0_33 = arith.constant 0 : index
      %c0_34 = arith.constant 0 : index
      %42 = vector.load %arg8[%c0_33, %c0_34] : memref<2x128xf32, #tpu.memory_space<vmem>>, vector<2x128xf32>
      tpu.vector_store %arg8[%c0_33, %c0_34], %41 {strides = array<i32>} : memref<2x128xf32, #tpu.memory_space<vmem>>, vector<2x128xf32>,
    } else {
    }
    %c0 = arith.constant 0 : index
    %c0_1 = arith.constant 0 : index
    %c0_2 = arith.constant 0 : index
    %3 = vector.load %arg3[%c0, %c0_1, %c0_2] : memref<1x2x128xf32, #tpu.memory_space<vmem>>, vector<1x2x128xf32>
    %4 = vector.shape_cast %3 : vector<1x2x128xf32> to vector<2x128xf32>
    %c0_3 = arith.constant 0 : index
    %c0_4 = arith.constant 0 : index
    %c0_5 = arith.constant 0 : index
    %5 = vector.load %arg4[%c0_3, %c0_4, %c0_5] : memref<1x2x128xi8, #tpu.memory_space<vmem>>, vector<1x2x128xi8>
    %6 = vector.shape_cast %5 : vector<1x2x128xi8> to vector<2x128xi8>
    %7 = arith.sitofp %6 : vector<2x128xi8> to vector<2x128xf32>
    %c0_6 = arith.constant 0 : index
    %c0_7 = arith.constant 0 : index
    %8 = vector.load %arg6[%c0_6, %c0_7] : memref<2x128xf32, #tpu.memory_space<vmem>>, vector<2x128xf32>
    %9 = arith.maximumf %8, %4 : vector<2x128xf32>
    %c0_8 = arith.constant 0 : index
    %c0_9 = arith.constant 0 : index
    %10 = vector.load %arg6[%c0_8, %c0_9] : memref<2x128xf32, #tpu.memory_space<vmem>>, vector<2x128xf32>
    tpu.vector_store %arg6[%c0_8, %c0_9], %9 {strides = array<i32>} : memref<2x128xf32, #tpu.memory_space<vmem>>, vector<2x128xf32>,
    %c0_10 = arith.constant 0 : index
    %c0_11 = arith.constant 0 : index
    %11 = vector.load %arg7[%c0_10, %c0_11] : memref<2x128xf32, #tpu.memory_space<vmem>>, vector<2x128xf32>
    %12 = arith.minimumf %11, %4 : vector<2x128xf32>
    %c0_12 = arith.constant 0 : index
    %c0_13 = arith.constant 0 : index
    %13 = vector.load %arg7[%c0_12, %c0_13] : memref<2x128xf32, #tpu.memory_space<vmem>>, vector<2x128xf32>
    tpu.vector_store %arg7[%c0_12, %c0_13], %12 {strides = array<i32>} : memref<2x128xf32, #tpu.memory_space<vmem>>, vector<2x128xf32>,
    %cst = arith.constant 1.000000e+00 : f32
    %14 = vector.broadcast %cst : f32 to vector<2x128xf32>
    %15 = arith.cmpf oeq, %7, %14 : vector<2x128xf32>
    %cst_14 = arith.constant 0.000000e+00 : f32
    %16 = vector.broadcast %cst_14 : f32 to vector<2x128xf32>
    %17 = arith.cmpf oge, %7, %16 : vector<2x128xf32>
    %cst_15 = arith.constant 0.000000e+00 : f32
    %18 = vector.broadcast %cst_15 : f32 to vector<2x128xf32>
    %19 = arith.subf %18, %4 : vector<2x128xf32>
    %20 = arith.select %15, %4, %19 : vector<2x128xi1>, vector<2x128xf32>
    %cst_16 = arith.constant 5.000000e-01 : f32
    %21 = vector.broadcast %cst_16 : f32 to vector<2x128xf32>
    %22 = arith.mulf %21, %20 : vector<2x128xf32>
    %23 = math.tanh %22 : vector<2x128xf32>
    %cst_17 = arith.constant 5.000000e-01 : f32
    %24 = vector.broadcast %cst_17 : f32 to vector<2x128xf32>
    %25 = arith.mulf %24, %23 : vector<2x128xf32>
    %cst_18 = arith.constant 5.000000e-01 : f32
    %26 = vector.broadcast %cst_18 : f32 to vector<2x128xf32>
    %27 = arith.addf %25, %26 : vector<2x128xf32>
    %28 = math.log %27 : vector<2x128xf32>
    %c0_19 = arith.constant 0 : index
    %c0_20 = arith.constant 0 : index
    %29 = vector.load %arg8[%c0_19, %c0_20] : memref<2x128xf32, #tpu.memory_space<vmem>>, vector<2x128xf32>
    %cst_21 = arith.constant 0.000000e+00 : f32
    %30 = vector.broadcast %cst_21 : f32 to vector<2x128xf32>
    %31 = arith.select %17, %28, %30 : vector<2x128xi1>, vector<2x128xf32>
    %32 = arith.addf %29, %31 : vector<2x128xf32>
    %c0_22 = arith.constant 0 : index
    %c0_23 = arith.constant 0 : index
    %33 = vector.load %arg8[%c0_22, %c0_23] : memref<2x128xf32, #tpu.memory_space<vmem>>, vector<2x128xf32>
    tpu.vector_store %arg8[%c0_22, %c0_23], %32 {strides = array<i32>} : memref<2x128xf32, #tpu.memory_space<vmem>>, vector<2x128xf32>,
    %c0_i32_24 = arith.constant 0 : i32
    %34 = arith.cmpi eq, %arg2, %c0_i32_24 : i32
    %35 = arith.extui %34 : i1 to i32
    %c0_i32_25 = arith.constant 0 : i32
    %36 = arith.cmpi ne, %35, %c0_i32_25 : i32
    scf.if %36 {
      %c0_26 = arith.constant 0 : index
      %c0_27 = arith.constant 0 : index
      %37 = vector.load %arg6[%c0_26, %c0_27] : memref<2x128xf32, #tpu.memory_space<vmem>>, vector<2x128xf32>
      %cst_28 = arith.constant dense<0xFF800000> : vector<2xf32>
      %38 = vector.multi_reduction <maximumf>, %37, %cst_28 [1] : vector<2x128xf32> to vector<2xf32>
      %39 = vector.shape_cast %38 : vector<2xf32> to vector<2x1xf32>
      %cst_29 = arith.constant dense<0xFF800000> : vector<1xf32>
      %40 = vector.multi_reduction <maximumf>, %39, %cst_29 [0] : vector<2x1xf32> to vector<1xf32>
      %41 = vector.shape_cast %40 : vector<1xf32> to vector<1x1xf32>
      %c0_30 = arith.constant 0 : index
      %c0_31 = arith.constant 0 : index
      %42 = vector.load %arg7[%c0_30, %c0_31] : memref<2x128xf32, #tpu.memory_space<vmem>>, vector<2x128xf32>
      %cst_32 = arith.constant dense<0x7F800000> : vector<2xf32>
      %43 = vector.multi_reduction <minimumf>, %42, %cst_32 [1] : vector<2x128xf32> to vector<2xf32>
      %44 = vector.shape_cast %43 : vector<2xf32> to vector<2x1xf32>
      %cst_33 = arith.constant dense<0x7F800000> : vector<1xf32>
      %45 = vector.multi_reduction <minimumf>, %44, %cst_33 [0] : vector<2x1xf32> to vector<1xf32>
      %46 = vector.shape_cast %45 : vector<1xf32> to vector<1x1xf32>
      %c0_34 = arith.constant 0 : index
      %c0_35 = arith.constant 0 : index
      %47 = vector.load %arg8[%c0_34, %c0_35] : memref<2x128xf32, #tpu.memory_space<vmem>>, vector<2x128xf32>
      %cst_36 = arith.constant dense<0.000000e+00> : vector<2xf32>
      %48 = vector.multi_reduction <add>, %47, %cst_36 [1] : vector<2x128xf32> to vector<2xf32>
      %49 = vector.shape_cast %48 : vector<2xf32> to vector<2x1xf32>
      %cst_37 = arith.constant dense<0.000000e+00> : vector<1xf32>
      %50 = vector.multi_reduction <add>, %49, %cst_37 [0] : vector<2x1xf32> to vector<1xf32>
      %51 = vector.shape_cast %50 : vector<1xf32> to vector<1x1xf32>
      %c0_38 = arith.constant 0 : index
      %c0_39 = arith.constant 0 : index
      %c0_40 = arith.constant 0 : index
      %c0_41 = arith.constant 0 : index
      %52 = vector.load %arg5[%c0_38, %c0_39, %c0_40, %c0_41] : memref<1x1x1x3xf32, #tpu.memory_space<vmem>>, vector<1x1x1x1xf32>
      %53 = vector.shape_cast %52 : vector<1x1x1x1xf32> to vector<1x1xf32>
      %54 = vector.shape_cast %41 : vector<1x1xf32> to vector<1x1x1x1xf32>
      tpu.vector_store %arg5[%c0_38, %c0_39, %c0_40, %c0_41], %54 {strides = array<i32>} : memref<1x1x1x3xf32, #tpu.memory_space<vmem>>, vector<1x1x1x1xf32>,
      %c0_42 = arith.constant 0 : index
      %c0_43 = arith.constant 0 : index
      %c0_44 = arith.constant 0 : index
      %c1 = arith.constant 1 : index
      %55 = vector.load %arg5[%c0_42, %c0_43, %c0_44, %c1] : memref<1x1x1x3xf32, #tpu.memory_space<vmem>>, vector<1x1x1x1xf32>
      %56 = vector.shape_cast %55 : vector<1x1x1x1xf32> to vector<1x1xf32>
      %57 = vector.shape_cast %46 : vector<1x1xf32> to vector<1x1x1x1xf32>
      tpu.vector_store %arg5[%c0_42, %c0_43, %c0_44, %c1], %57 {strides = array<i32>} : memref<1x1x1x3xf32, #tpu.memory_space<vmem>>, vector<1x1x1x1xf32>,
      %cst_45 = arith.constant 0.000000e+00 : f32
      %58 = vector.broadcast %cst_45 : f32 to vector<1x1xf32>
      %59 = arith.subf %58, %51 : vector<1x1xf32>
      %c0_46 = arith.constant 0 : index
      %c0_47 = arith.constant 0 : index
      %c0_48 = arith.constant 0 : index
      %c2 = arith.constant 2 : index
      %60 = vector.load %arg5[%c0_46, %c0_47, %c0_48, %c2] : memref<1x1x1x3xf32, #tpu.memory_space<vmem>>, vector<1x1x1x1xf32>
      %61 = vector.shape_cast %60 : vector<1x1x1x1xf32> to vector<1x1xf32>
      %62 = vector.shape_cast %59 : vector<1x1xf32> to vector<1x1x1x1xf32>
      tpu.vector_store %arg5[%c0_46, %c0_47, %c0_48, %c2], %62 {strides = array<i32>} : memref<1x1x1x3xf32, #tpu.memory_space<vmem>>, vector<1x1x1x1xf32>,
    } else {
    }
    return
  }
  func.func @transform_0(%arg0: i32, %arg1: i32, %arg2: i32) -> (i32, i32, i32) {
    %c1_i32 = arith.constant 1 : i32
    %0 = arith.muli %arg1, %c1_i32 : i32
    %1 = arith.addi %0, %arg2 : i32
    %c0_i32 = arith.constant 0 : i32
    %2 = arith.minsi %1, %c0_i32 : i32
    %c0_i32_0 = arith.constant 0 : i32
    %c0_i32_1 = arith.constant 0 : i32
    return %arg0, %2, %c0_i32_0 : i32, i32, i32
  }
  func.func @transform_1(%arg0: i32, %arg1: i32, %arg2: i32) -> (i32, i32, i32) {
    %c1_i32 = arith.constant 1 : i32
    %0 = arith.muli %arg1, %c1_i32 : i32
    %1 = arith.addi %0, %arg2 : i32
    %c0_i32 = arith.constant 0 : i32
    %2 = arith.minsi %1, %c0_i32 : i32
    %c0_i32_0 = arith.constant 0 : i32
    %c0_i32_1 = arith.constant 0 : i32
    return %arg0, %2, %c0_i32_0 : i32, i32, i32
  }
  func.func @transform_2(%arg0: i32, %arg1: i32, %arg2: i32) -> (i32, i32, i32, i32) {
    %c0_i32 = arith.constant 0 : i32
    %c0_i32_0 = arith.constant 0 : i32
    %c0_i32_1 = arith.constant 0 : i32
    return %arg0, %arg1, %c0_i32, %c0_i32_0 : i32, i32, i32, i32
  }
}

</mosaic_0001>

<bundles_post_ra>
// kernel: tpu_custom_call.1
= control target key start
LH: loop header
LB: loop body
LE: loop exit
PB: predicated region body
PF: predicated region fallthrough
CT: control target
= control target key end

     0   :  { %7 = vsyncpa [#allocation6], 0  ;;  %s852_s0 = inlined_call_operand.hbm [shape: f32[2,2,128], index: 0, kind: input, shape index: {}]   ;;  %s853_s1 = inlined_call_operand.hbm [shape: s8[2,2,128], index: 1, kind: input, shape index: {}]   ;;  %s854_s2 = inlined_call_operand.hbm [shape: f32[2,1,1,3], index: 2, kind: output, shape index: {}]  }
   0x1   :  { %9 = vsyncpa [#allocation6 + $0x1], 0 }
   0x2   :  { %10 = vsyncpa [#allocation9], 0 }
   0x3   :  { %12 = vsyncpa [#allocation9 + $0x1], 0 }
   0x4   :  { %13 = vsyncpa [#allocation7], 0 }
   0x5   :  { %15 = vsyncpa [#allocation7 + $0x1], 0  ;;  %s681_s9 = smov 0   ;;  %s683_s10 = smov 0  }
   0x6   :  { %s685_s11 = smov 0   ;;  %s687_s12 = smov 0  }
   0x7   :  { %s689_s13 = smov 0   ;;  %s691_s14 = smov 0  }
   0x8 LB: > { %s432_s15 = sadd.s32 4294967295, %s658_s14   ;;  %s433_s16 = sadd.s32 4294967294, %s658_s14   ;;  %s658_s14 = sphi %s691_s14, %s21_s14   ;;  %s654_s13 = sphi %s689_s13, %s866_s13   ;;  %s650_s12 = sphi %s687_s12, %s865_s12   ;;  %s646_s11 = sphi %s685_s11, %s864_s11   ;;  %s642_s10 = sphi %s683_s10, %s863_s10   ;;  %s638_s9 = sphi %s681_s9, %s862_s9  }
   0x9   : > { %s40_s17 = sadd.s32 1, %s654_s13  ;;  %s55_s18 = sadd.s32 1, %s646_s11 }
   0xa   : > { %p42_p0 = scmp.ge.s32.totalorder %s40_s17, 2  ;;  %p62_p1 = scmp.ne.s32.totalorder %s646_s11, %s642_s10 }
   0xb   : > { %p63_p2 = scmp.eq.s32.totalorder %s658_s14, 0  ;;  %p68_p3 = scmp.ne.s32.totalorder %s642_s10, %s638_s9 }
   0xc   : > { %s868_s17 = smov (%p42_p0, %s40_s17), 0  ;;  %p69_p5 = scmp.eq.s32.totalorder %s432_s15, 0 }
   0xd   : > { %p722_p4 = por %p63_p2, %p62_p1  ;;  %s50_s20 = ssub.s32 %s654_s13, %s868_s17 }
   0xe   : > { %p128_p6 = scmp.eq.s32.totalorder %s432_s15, 1  ;;  %p53_p7 = scmp.eq.s32.totalorder %s50_s20, 0 }
   0xf   : > { %p728_p8 = por %p69_p5, %p68_p3  ;;  %p134_p10 = scmp.eq.s32.totalorder %s433_s16, 1 }
  0x10   : > { %p732_p9 = por %p128_p6, %p62_p1  ;;  %p461_p13 = scmp.lt.s32.totalorder %s658_s14, 2 }
  0x11   : > { %s737_s23 = scalar_select %p53_p7, %s646_s11, %s55_s18  }
  0x12   : > { %p739_p11 = por %p134_p10, %p68_p3  ;;  %s746_s25 = sand.u32 1, %s646_s11  }
  0x13   : > { %s436_s26 = sshll.u32 %s746_s25, 1  ;;  %s437_s27 = sshll.u32 %s654_s13, 5 }
  0x14   : > { %s167_s30 = scalar_lea.hbm %s852_s0, %s437_s27  ;;  %s158_s3 = scalar_lea.vmem [#allocation5], %s436_s26 }
  0x15   : > { %s169_s4 = sshll.u32 %s158_s3, 4  ;;  %p755_p0 = pnand %p461_p13, %p722_p4  ;;  %s170_s4 = int_to_ptr.vmem [resolvable:$true] %s169_s4 }
  0x16   : > { %p439_p1 = scmp.ge.s32.totalorder %s658_s14, 1  ;;  %p195_p2 = scmp.lt.s32.totalorder %s658_s14, 3 }
  0x17   : > { %s155_s6 = scalar_lea.sflag [#allocation6], %s746_s25  ;;  %p520_p3 = pneg %p755_p0 }
  0x18   : > { %s531_s7 = scalar_lea.vmem %s170_s4, 32  ;;  %s660_s8 = smov [#allocation5]  }
  0x19   : > { %p532_p5 = scmp.ne.s32.totalorder %s170_s4, %s531_s7  ;;  %s536_s15 = sshll.u32 %s660_s8, 4  ;;  %s537_s15 = int_to_ptr.vmem [resolvable:$false] %s536_s15 }
  0x1a   : > { %s538_s16 = scalar_lea.vmem %s537_s15, 64  ;;  %p539_p4 = scmp.lt.s32.totalorder %s170_s4, %s537_s15 }
  0x1b   : > { %p534_p6 = pnand %p532_p5, %p520_p3  ;;  %p540_p10 = scmp.lt.s32.totalorder %s538_s16, %s531_s7 }
  0x1d   : > { %p535_p7 = pneg %p534_p6  ;;  %p541_p13 = por %p540_p10, %p539_p4 }
  0x1f   : > { %p542_p12 = pnand %p541_p13, %p535_p7 }
  0x21   : > { %545 = shalt.err (!%p542_p12)
}
  0x22   : > { %453 = dma.hbm_to_vmem [thread:$0]  (!%p755_p0), %s167_s30, 32, %s170_s4, %s155_s6  }
  0x23   : > { %p773_p5 = pnand %p439_p1, %p195_p2  ;;  %s438_s19 = sshll.u32 %s654_s13, 4 }
  0x24   : > { %s179_s20 = scalar_lea.vmem [#allocation8], %s746_s25  ;;  %s188_s29 = scalar_lea.hbm %s853_s1, %s438_s19 }
  0x25   : > { %s190_s26 = sshll.u32 %s179_s20, 4  ;;  %s177_s3 = scalar_lea.sflag [#allocation9], %s746_s25  ;;  %s191_s26 = int_to_ptr.vmem [resolvable:$true] %s190_s26 }
  0x26   : > { %s559_s7 = scalar_lea.vmem %s191_s26, 16  ;;  %s661_s30 = smov [#allocation8]  }
  0x27   : > { %p560_p12 = scmp.ne.s32.totalorder %s191_s26, %s559_s7  ;;  %s564_s4 = sshll.u32 %s661_s30, 4  ;;  %s565_s4 = int_to_ptr.vmem [resolvable:$false] %s564_s4 }
  0x28   : > { %s566_s6 = scalar_lea.vmem %s565_s4, 32  ;;  %p567_p1 = scmp.lt.s32.totalorder %s191_s26, %s565_s4 }
  0x29   : > { %p562_p6 = pnand %p560_p12, %p520_p3  ;;  %p568_p2 = scmp.lt.s32.totalorder %s566_s6, %s559_s7 }
  0x2b   : > { %p563_p7 = pneg %p562_p6  ;;  %p569_p4 = por %p568_p2, %p567_p1 }
  0x2d   : > { %p570_p10 = pnand %p569_p4, %p563_p7 }
  0x2f   : > { %573 = shalt.err (!%p570_p10)
}
  0x30   : > { %456 = dma.hbm_to_vmem [thread:$0]  (!%p755_p0), %s188_s29, 16, %s191_s26, %s177_s3  }
  0x31   : > { %199 = sbr.rel (%p773_p5) target bundleno = 279 (0x117), region = 28  ;;  %s791_s25 = sand.u32 (!%p773_p5), 1, %s642_s10  }
  0x32   : > { %s440_s8 = sshll.u32 (!%p773_p5), %s791_s25, 1  ;;  %s202_s15 = scalar_lea.sflag (!%p773_p5), [#allocation6], %s791_s25 }
  0x33   : > { %s205_s16 = scalar_lea.vmem (!%p773_p5), [#allocation5], %s440_s8 }
  0x36   : > { %625 = dma.done.wait (%p728_p8), %s202_s15, 32  }
  0x37   : > { %627 = vsyncadd (%p728_p8), %s202_s15, 4294967264  ;;  %s211_s5 = scalar_lea.sflag [#allocation9], %s791_s25  ;;  %s213_s18 = scalar_lea.vmem [#allocation8], %s791_s25 }
  0x38   : > { %629 = dma.done.wait (%p728_p8), %s211_s5, 16  }
  0x39   : > { %631 = vsyncadd (%p728_p8), %s211_s5, 4294967280  ;;  %v662_v0 = vmov -inf   ;;  %v663_v1 = vmov inf   ;;  %v664_v2 = vmov 0.0   ;;  %v250_v3 = vld [vmem:[%s205_s16] sm:$0x3] }
  0x3a   : > { %247 = vst [vmem:[#allocation2] sm:$0x3] %v662_v0  ;;  %248 = vst [vmem:[#allocation3] sm:$0x3] %v663_v1  ;;  %v251_v4 = vld [vmem:[%s213_s18] sm:$0x1] }
  0x3b   : > { %249 = vst [vmem:[#allocation4] sm:$0x3] %v664_v2  ;;  %v252_v7 = vunpack.c.0.s8 %v251_v4  ;;  %v262_v9 = vsub.f32 0.0, %v250_v3  ;;  %vm278_vm1 = vcmask 1041408   ;;  %vm311_vm3 = vcmask 0   ;;  %s236_s21 = scalar_lea.vmem [#allocation10], %s791_s25 }
  0x3c   : > { %vm313_vm4 = vcmask 8200   ;;  %s441_s19 = sshll.u32 %s650_s12, 4  ;;  %s332_s20 = sshll.u32 %s236_s21, 4  ;;  %vm316_vm5 = vcmask 16400   ;;  %s333_s20 = int_to_ptr.vmem [resolvable:$true] %s332_s20 }
  0x3d   : > { %v253_v11 = vcvt.s32.f32 %v252_v7  ;;  %s330_s28 = scalar_lea.hbm %s854_s2, %s441_s19  ;;  %s319_s29 = scalar_lea.sflag [#allocation7], %s791_s25 }
  0x3e   : > { %s574_s3 = scalar_lea.vmem %s333_s20, 16  ;;  %s665_s7 = smov [#allocation10]  }
  0x3f   : > { %vm260_vm0 = vcmp.eq.f32.partialorder %v253_v11, 1.0  ;;  %vm261_vm2 = vcmp.ge.f32.partialorder %v253_v11, 0.0  ;;  %p575_p8 = scmp.ne.s32.totalorder %s333_s20, %s574_s3  ;;  %s578_s30 = sshll.u32 %s665_s7, 4  ;;  %s579_s30 = int_to_ptr.vmem [resolvable:$false] %s578_s30 }
  0x40   : > { %v263_v12 = vsel %vm260_vm0, %v250_v3, %v262_v9  ;;  %s580_s12 = scalar_lea.vmem %s579_s30, 32  ;;  %p581_p13 = scmp.lt.s32.totalorder %s333_s20, %s579_s30 }
  0x41   : > { %v254_v5 = vld [vmem:[#allocation2] sm:$0x3]  ;;  %v257_v6 = vld [vmem:[#allocation3] sm:$0x3]  ;;  %v264_v13 = vmul.f32 0.5, %v263_v12  ;;  %p576_p0 = pnand %p575_p8, %p732_p9  ;;  %p582_p5 = scmp.lt.s32.totalorder %s580_s12, %s574_s3 }
  0x42   : > { %v255_v8 = vmax.f32 %v254_v5, %v250_v3  ;;  %v258_v10 = vmin.f32 %v257_v6, %v250_v3  ;;  %v270_v23 = vld [vmem:[#allocation4] sm:$0x3] }
  0x43   : > { %514 = vtanh.f32 %v264_v13  ;;  %p577_p3 = pneg %p576_p0  ;;  %p583_p12 = por %p582_p5, %p581_p13 }
  0x44   : > { %256 = vst [vmem:[#allocation2] sm:$0x3] %v255_v8  ;;  %259 = vst [vmem:[#allocation3] sm:$0x3] %v258_v10 }
  0x45   : > { %p584_p6 = pnand %p583_p12, %p577_p3 }
  0x4b   : > { %v277_v14 = vld [vmem:[#allocation2] sm:$0x3]  ;;  %v289_v15 = vld [vmem:[#allocation3] sm:$0x3] }
  0x4c   : > { %v279_v16 = vsel %vm278_vm1, %v277_v14, -inf  ;;  %v290_v17 = vsel %vm278_vm1, %v289_v15, inf }
  0x4d   : > { %280 = vmax.xlane.f32.xlu0 %v279_v16  ;;  %291 = vmin.xlane.f32.xlu1 %v290_v17 }
  0x50   : > { %v515_v18 = vpop.eup %514 }
  0x51   : > { %v266_v19 = vmul.f32 0.5, %v515_v18 }
  0x53   : > { %v267_v20 = vadd.f32 0.5, %v266_v19 }
  0x55   : > { %516 = vlog2.f32 %v267_v20 }
  0x62   : > { %v517_v21 = vpop.eup %516 }
  0x63   : > { %v269_v22 = vmul.f32 0.6931472, %v517_v21 }
  0x65   : > { %v271_v24 = vsel %vm261_vm2, %v269_v22, 0.0 }
  0x66   : > { %v272_v25 = vadd.f32 %v271_v24, %v270_v23 }
  0x68   : > { %273 = vst [vmem:[#allocation4] sm:$0x3] %v272_v25 }
  0x6f   : > { %v300_v26 = vld [vmem:[#allocation4] sm:$0x3] }
  0x70   : > { %v301_v27 = vsel %vm278_vm1, %v300_v26, 0.0 }
  0x71   : > { %302 = vadd.xlane.f32.xlu0 %v301_v27 }
  0xd6   : > { %v281_v28 = vpop.xlane.xlu0 %280  ;;  %v292_v29 = vpop.xlane.xlu1 %291 }
  0xd7   : > { %v282_v30 = vsel %vm278_vm1, %v281_v28, -inf  ;;  %v293_v31 = vsel %vm278_vm1, %v292_v29, inf }
  0xd8   : > { %v283_v32 = vrot.slane %v282_v30, 4  ;;  %v294_v33 = vrot.slane %v293_v31, 4 }
  0xda   : > { %v284_v34 = vmax.f32 %v282_v30, %v283_v32  ;;  %v295_v35 = vmin.f32 %v293_v31, %v294_v33 }
  0xdc   : > { %v285_v36 = vrot.slane %v284_v34, 2  ;;  %v296_v37 = vrot.slane %v295_v35, 2 }
  0xde   : > { %v286_v38 = vmax.f32 %v284_v34, %v285_v36  ;;  %v297_v39 = vmin.f32 %v295_v35, %v296_v37 }
  0xe0   : > { %v287_v40 = vrot.slane %v286_v38, 1  ;;  %v298_v41 = vrot.slane %v297_v39, 1 }
  0xe2   : > { %v288_v42 = vmax.f32 %v286_v38, %v287_v40  ;;  %v299_v43 = vmin.f32 %v297_v39, %v298_v41 }
  0xe4   : > { %312 = vst.msk [vmem:[%s236_s21] sm:$0x1] %vm311_vm3, %v288_v42 }
  0xe5   : > { %314 = vst.msk [vmem:[%s236_s21] sm:$0x1] %vm313_vm4, %v299_v43 }
  0xfa   : > { %v303_v44 = vpop.xlane.xlu0 %302 }
  0xfb   : > { %v304_v45 = vsel %vm278_vm1, %v303_v44, 0.0 }
  0xfc   : > { %v305_v46 = vrot.slane %v304_v45, 4 }
  0xfe   : > { %v306_v47 = vadd.f32 %v305_v46, %v304_v45 }
 0x100   : > { %v307_v48 = vrot.slane %v306_v47, 2 }
 0x102   : > { %v308_v49 = vadd.f32 %v307_v48, %v306_v47 }
 0x104   : > { %v309_v50 = vrot.slane %v308_v49, 1 }
 0x106   : > { %v310_v51 = vadd.f32 %v309_v50, %v308_v49 }
 0x108   : > { %v315_v52 = vsub.f32 0.0, %v310_v51 }
 0x10a   : > { %317 = vst.msk [vmem:[%s236_s21] sm:$0x1] %vm316_vm5, %v315_v52 }
 0x10b   : > { %587 = shalt.err (!%p584_p6)
}
 0x10c   : > { %s588_s4 = scalar_lea.hbm %s330_s28, 16  ;;  %s592_s8 = scalar_lea.hbm %s854_s2, 32 }
 0x10d   : > { %p589_p7 = scmp.ne.s32.totalorder %s330_s28, %s588_s4  ;;  %p593_p4 = scmp.lt.s32.totalorder %s330_s28, %s854_s2 }
 0x10e   : > { %p594_p10 = scmp.lt.s32.totalorder %s592_s8, %s588_s4 }
 0x10f   : > { %p590_p1 = pnand %p589_p7, %p732_p9 }
 0x110   : > { %p595_p8 = por %p594_p10, %p593_p4 }
 0x111   : > { %p591_p2 = pneg %p590_p1 }
 0x113   : > { %p596_p0 = pnand %p595_p8, %p591_p2 }
 0x115   : > { %599 = shalt.err (!%p596_p0)
}
 0x116   : > { %448 = dma.vmem_to_hbm [thread:$0]  (%p732_p9), %s333_s20, 16, %s330_s28, %s319_s29  }
 0x117 PF: > { %s344_s5 = sand.u32 1, %s638_s9   ;;  %p861_p3 = scmp.ge.s32.totalorder %s658_s14, 2 }
 0x118   : > { %s345_s18 = scalar_lea.sflag [#allocation7], %s344_s5 }
 0x119   : > { %p458_p13 = pnand %p861_p3, %p739_p11 }
 0x11b   : > { %p459_p5 = pneg %p458_p13 }
 0x11d   : > { %633 = dma.done.wait (%p459_p5), %s345_s18, 16  }
 0x11e   : > { %635 = vsyncadd (%p459_p5), %s345_s18, 4294967280  ;;  %s21_s14 = sadd.s32 1, %s658_s14   ;;  %s862_s9 = smov %s642_s10 }
 0x11f   : > { %p18_p12 = scmp.ge.s32.totalorder %s21_s14, 4   ;;  %s863_s10 = smov %s646_s11 }
 0x120   : > { %s864_s11 = smov %s737_s23  ;;  %s865_s12 = smov %s654_s13 }
 0x121   : > { %s866_s13 = smov %s868_s17  ;;  %20 = sbr.rel (!%p18_p12) target bundleno = 8 (0x8), region = 94 }
 0x126   :  { %349 = vsyncpa [#allocation6], 1 }
 0x127   :  { %351 = vsyncpa [#allocation6 + $0x1], 1 }
 0x128   :  { %352 = vsyncpa [#allocation9], 1 }
 0x129   :  { %354 = vsyncpa [#allocation9 + $0x1], 1 }
 0x12a   :  { %355 = vsyncpa [#allocation7], 1 }
 0x12b   :  { %357 = vsyncpa [#allocation7 + $0x1], 1 }

</bundles_post_ra>
